<compile_context>
chip_gen: v7x
topology: tpu7x:2x2x1
jax: 0.10.0
libtpu: 0.0.40
codegen_flags: <defaults>
</compile_context>

<pallas_src>
import functools

import jax
import jax.numpy as jnp
from jax.experimental import pallas as pl
from jax.experimental.pallas import tpu as pltpu


def _norm_kernel(x_ref, alpha_ref, bias_ref, o_ref, *, eps):
    x = x_ref[...].astype(jnp.float32)                         # (rows_blk, D)
    d = x.shape[-1]
    mean = jnp.mean(x, axis=-1, keepdims=True)                 # (rows_blk, 1)
    xc = x - mean
    # torch.Tensor.std defaults to the unbiased estimator (divide by N-1).
    inv_nm1 = jnp.float32(1.0 / float(max(d - 1, 1)))
    var = jnp.sum(xc * xc, axis=-1, keepdims=True) * inv_nm1   # (rows_blk, 1)
    std = jnp.sqrt(var)
    # Exact reciprocal on the tiny (rows, 1) column; the wide (rows, D) path
    # below is multiplies + one add only.
    inv = jnp.float32(1.0) / (std + jnp.float32(eps))          # (rows_blk, 1)
    out = (xc * inv) * alpha_ref[...] + bias_ref[...]
    o_ref[...] = out.astype(o_ref.dtype)


def _choose_row_block(n_rows, d_model, itemsize,
                      max_block_bytes=8 * 1024 * 1024, max_rows=1024):
    """Pick rows-per-block so blocks stay in VMEM and (ideally) divide n_rows."""
    # Live bytes per row: double-buffered input + output blocks + ~1 f32 temp.
    bytes_per_row = d_model * (2 * 2 * itemsize + 4)
    cap = max(max_block_bytes // max(bytes_per_row, 1), 8)
    cap = min(cap, max_rows, n_rows)
    if n_rows <= cap:
        # Single block covering the whole (small) row extent; block shape
        # equal to the full array dim is always layout-legal.
        return n_rows
    # Prefer the largest multiple of 8 <= cap that exactly divides n_rows
    # (no host padding, no partial blocks).
    cap8 = max((cap // 8) * 8, 8)
    for rb in range(cap8, 0, -8):
        if n_rows % rb == 0:
            return rb
    # No exact divisor: the wrapper will pad rows up to a multiple of cap8.
    return cap8


def norm_forward(x, alpha, bias, eps=1e-6, row_block=None):
    """x: (..., d_model); alpha, bias: (d_model,). Normalizes over the last axis."""
    orig_shape = x.shape
    d_model = orig_shape[-1]
    x2 = x.reshape(-1, d_model)
    n_rows = x2.shape[0]

    if row_block is None:
        row_block = _choose_row_block(n_rows, d_model, x2.dtype.itemsize)
    row_block = max(min(row_block, n_rows), 1)

    # Make the grid exact: pad rows only if row_block does not divide n_rows.
    padded_rows = n_rows
    if n_rows % row_block != 0:
        padded_rows = ((n_rows + row_block - 1) // row_block) * row_block
        x2 = jnp.pad(x2, ((0, padded_rows - n_rows), (0, 0)))

    # Tiny parameter rows: cast once on the host side; they stay resident
    # (same block every grid step).
    alpha2 = alpha.reshape(1, d_model).astype(jnp.float32)
    bias2 = bias.reshape(1, d_model).astype(jnp.float32)

    grid = (padded_rows // row_block,)

    out = pl.pallas_call(
        functools.partial(_norm_kernel, eps=eps),
        out_shape=jax.ShapeDtypeStruct((padded_rows, d_model), x.dtype),
        grid_spec=pltpu.PrefetchScalarGridSpec(
            num_scalar_prefetch=0,
            grid=grid,
            in_specs=[
                pl.BlockSpec((row_block, d_model), lambda i: (i, 0)),
                pl.BlockSpec((1, d_model), lambda i: (0, 0)),
                pl.BlockSpec((1, d_model), lambda i: (0, 0)),
            ],
            out_specs=pl.BlockSpec((row_block, d_model), lambda i: (i, 0)),
        ),
        compiler_params=pltpu.CompilerParams(
            dimension_semantics=("parallel",),
            # Above the 16/32 MiB scoped defaults (v5e/v6e) but comfortably
            # inside v7x's 64 MiB physical VMEM per TensorCore.
            vmem_limit_bytes=48 * 1024 * 1024,
        ),
    )(x2, alpha2, bias2)

    if padded_rows != n_rows:
        out = out[:n_rows]
    return out.reshape(orig_shape)


def _reference(x, alpha, bias, eps=1e-6):
    xf = x.astype(jnp.float32)
    mean = jnp.mean(xf, axis=-1, keepdims=True)
    xc = xf - mean
    var = jnp.sum(xc * xc, axis=-1, keepdims=True) / (xf.shape[-1] - 1)
    std = jnp.sqrt(var)
    return (alpha * xc / (std + eps) + bias).astype(x.dtype)


if __name__ == "__main__":
    key = jax.random.PRNGKey(0)
    kx, ka, kb = jax.random.split(key, 3)

    # Lane-dense last axis (128); 2*8 = 16 rows.
    batch, seq, d_model = 2, 8, 128
    x = jax.random.normal(kx, (batch, seq, d_model), dtype=jnp.float32)
    # Non-trivial affine params so the alpha/bias path is actually exercised
    # (the module itself initializes ones/zeros).
    alpha = 1.0 + 0.1 * jax.random.normal(ka, (d_model,), dtype=jnp.float32)
    bias = 0.1 * jax.random.normal(kb, (d_model,), dtype=jnp.float32)

    ref = _reference(x, alpha, bias, eps=1e-6)

    # 1) Auto-sized single-block path.
    out = jax.block_until_ready(norm_forward(x, alpha, bias, eps=1e-6))
    assert out.shape == x.shape
    assert jnp.allclose(out, ref, atol=1e-4, rtol=1e-4), "mismatch vs reference"

    # 2) Multi-block path (row_block divides the row count exactly).
    out2 = jax.block_until_ready(norm_forward(x, alpha, bias, eps=1e-6, row_block=8))
    assert jnp.allclose(out2, ref, atol=1e-4, rtol=1e-4), "mismatch vs reference (tiled)"

    # 3) Row count not divisible by the block: pad + slice path.
    x3 = jax.random.normal(kx, (2, 9, d_model), dtype=jnp.float32)  # 18 rows
    ref3 = _reference(x3, alpha, bias, eps=1e-6)
    out3 = jax.block_until_ready(norm_forward(x3, alpha, bias, eps=1e-6, row_block=8))
    assert out3.shape == x3.shape
    assert jnp.allclose(out3, ref3, atol=1e-4, rtol=1e-4), "mismatch vs reference (padded)"

    print("KERNEL_OK")
</pallas_src>

<mosaic_0001>
module attributes {stable_mosaic.version = 11 : i64} {
  func.func @_norm_kernel(%arg0: i32, %arg1: memref<16x128xf32, #tpu.memory_space<vmem>>, %arg2: memref<1x128xf32, #tpu.memory_space<vmem>>, %arg3: memref<1x128xf32, #tpu.memory_space<vmem>>, %arg4: memref<16x128xf32, #tpu.memory_space<vmem>>) attributes {dimension_semantics = [#tpu.dimension_semantics<parallel>], iteration_bounds = array<i64: 1>, scalar_prefetch = 0 : i64, scratch_operands = 0 : i64, tpu.core_type = #tpu.core_type<tc>, window_params = [{transform_indices = @transform_0, window_bounds = array<i64: 16, 128>}, {pipeline_mode = #tpu.pipeline_mode<synchronous>, transform_indices = @transform_1, window_bounds = array<i64: 1, 128>}, {pipeline_mode = #tpu.pipeline_mode<synchronous>, transform_indices = @transform_2, window_bounds = array<i64: 1, 128>}, {transform_indices = @transform_3, window_bounds = array<i64: 16, 128>}]} {
    %c0 = arith.constant 0 : index
    %c0_0 = arith.constant 0 : index
    %0 = vector.load %arg1[%c0, %c0_0] : memref<16x128xf32, #tpu.memory_space<vmem>>, vector<16x128xf32>
    %cst = arith.constant dense<0.000000e+00> : vector<16xf32>
    %1 = vector.multi_reduction <add>, %0, %cst [1] : vector<16x128xf32> to vector<16xf32>
    %2 = vector.shape_cast %1 : vector<16xf32> to vector<16x1xf32>
    %cst_1 = arith.constant 1.280000e+02 : f32
    %3 = vector.broadcast %cst_1 : f32 to vector<16x1xf32>
    %4 = arith.divf %2, %3 : vector<16x1xf32>
    %5 = vector.broadcast %4 : vector<16x1xf32> to vector<16x128xf32>
    %6 = arith.subf %0, %5 : vector<16x128xf32>
    %7 = arith.mulf %6, %6 : vector<16x128xf32>
    %cst_2 = arith.constant dense<0.000000e+00> : vector<16xf32>
    %8 = vector.multi_reduction <add>, %7, %cst_2 [1] : vector<16x128xf32> to vector<16xf32>
    %9 = vector.shape_cast %8 : vector<16xf32> to vector<16x1xf32>
    %cst_3 = arith.constant 0.00787401571 : f32
    %10 = vector.broadcast %cst_3 : f32 to vector<16x1xf32>
    %11 = arith.mulf %9, %10 : vector<16x1xf32>
    %12 = math.sqrt %11 : vector<16x1xf32>
    %cst_4 = arith.constant 9.99999997E-7 : f32
    %13 = vector.broadcast %cst_4 : f32 to vector<16x1xf32>
    %14 = arith.addf %12, %13 : vector<16x1xf32>
    %cst_5 = arith.constant 1.000000e+00 : f32
    %15 = vector.broadcast %cst_5 : f32 to vector<16x1xf32>
    %16 = arith.divf %15, %14 : vector<16x1xf32>
    %17 = vector.broadcast %16 : vector<16x1xf32> to vector<16x128xf32>
    %18 = arith.mulf %6, %17 : vector<16x128xf32>
    %c0_6 = arith.constant 0 : index
    %c0_7 = arith.constant 0 : index
    %19 = vector.load %arg2[%c0_6, %c0_7] : memref<1x128xf32, #tpu.memory_space<vmem>>, vector<1x128xf32>
    %20 = vector.broadcast %19 : vector<1x128xf32> to vector<16x128xf32>
    %21 = arith.mulf %18, %20 : vector<16x128xf32>
    %c0_8 = arith.constant 0 : index
    %c0_9 = arith.constant 0 : index
    %22 = vector.load %arg3[%c0_8, %c0_9] : memref<1x128xf32, #tpu.memory_space<vmem>>, vector<1x128xf32>
    %23 = vector.broadcast %22 : vector<1x128xf32> to vector<16x128xf32>
    %24 = arith.addf %21, %23 : vector<16x128xf32>
    %c0_10 = arith.constant 0 : index
    %c0_11 = arith.constant 0 : index
    %25 = vector.load %arg4[%c0_10, %c0_11] : memref<16x128xf32, #tpu.memory_space<vmem>>, vector<16x128xf32>
    tpu.vector_store %arg4[%c0_10, %c0_11], %24 {strides = array<i32>} : memref<16x128xf32, #tpu.memory_space<vmem>>, vector<16x128xf32>,
    return
  }
  func.func @transform_0(%arg0: i32) -> (i32, i32) {
    %c0_i32 = arith.constant 0 : i32
    %c0_i32_0 = arith.constant 0 : i32
    return %arg0, %c0_i32 : i32, i32
  }
  func.func @transform_1(%arg0: i32) -> (i32, i32) {
    %c0_i32 = arith.constant 0 : i32
    %c0_i32_0 = arith.constant 0 : i32
    %c0_i32_1 = arith.constant 0 : i32
    return %c0_i32, %c0_i32_0 : i32, i32
  }
  func.func @transform_2(%arg0: i32) -> (i32, i32) {
    %c0_i32 = arith.constant 0 : i32
    %c0_i32_0 = arith.constant 0 : i32
    %c0_i32_1 = arith.constant 0 : i32
    return %c0_i32, %c0_i32_0 : i32, i32
  }
  func.func @transform_3(%arg0: i32) -> (i32, i32) {
    %c0_i32 = arith.constant 0 : i32
    %c0_i32_0 = arith.constant 0 : i32
    return %arg0, %c0_i32 : i32, i32
  }
}

</mosaic_0001>

<bundles_post_ra>
// kernel: tpu_custom_call.1
= control target key start
LH: loop header
LB: loop body
LE: loop exit
PB: predicated region body
PF: predicated region fallthrough
CT: control target
= control target key end

     0   :  { %8 = vsyncpa [#allocation3], 0  ;;  %s229_s0 = inlined_call_operand.hbm [shape: f32[16,128], index: 0, kind: input, shape index: {}]   ;;  %s230_s1 = inlined_call_operand.vmem [shape: f32[1,128], index: 1, kind: input, shape index: {}]   ;;  %s231_s2 = inlined_call_operand.vmem [shape: f32[1,128], index: 2, kind: input, shape index: {}]   ;;  %s232_s3 = inlined_call_operand.hbm [shape: f32[16,128], index: 3, kind: output, shape index: {}]  }
   0x1   :  { %9 = vsyncpa [#allocation4], 0  ;;  %s169_s12 = smov [#allocation2]   ;;  %s121_s16 = scalar_lea.hbm %s229_s0, 256 }
   0x2   :  { %s15_s13 = sshll.u32 %s169_s12, 4  ;;  %p122_p0 = scmp.ne.s32.totalorder %s229_s0, %s121_s16  ;;  %s16_s13 = int_to_ptr.vmem [resolvable:$true] %s15_s13 }
   0x3   :  { %p125_p1 = scmp.lt.u32.totalorder %s121_s16, %s229_s0 }
   0x5   :  { %p127_p2 = pnand %p125_p1, %p122_p0 }
   0x7   :  { %130 = shalt.err (!%p127_p2)
}
   0x8   :  { %s131_s21 = scalar_lea.vmem %s16_s13, 256  ;;  %p136_p4 = scmp.lt.s32.totalorder %s16_s13, %s16_s13 }
   0x9   :  { %p132_p3 = scmp.ne.s32.totalorder %s16_s13, %s131_s21  ;;  %p137_p5 = scmp.lt.s32.totalorder %s131_s21, %s131_s21 }
   0xb   :  { %p138_p6 = por %p137_p5, %p136_p4 }
   0xd   :  { %p139_p7 = pnand %p138_p6, %p132_p3 }
   0xf   :  { %142 = shalt.err (!%p139_p7)
}
  0x10   :  { %s170_s22 = smov 128   ;;  %s171_s23 = smov 8  }
  0x11   :  { %21 = dma.hbm_to_vmem [thread:$0]  %s229_s0, 256, %s16_s13, [#allocation3], %s170_s22, %s170_s22, %s171_s23  }
  0x12   :  { %165 = dma.done.wait [#allocation3], 256  }
  0x13   :  { %166 = vsyncadd [#allocation3], 4294967040  ;;  %v29_v0 = vld [vmem:[#allocation2] sm:$0xff]  ;;  %v30_v1 = vld [vmem:[#allocation2 + $0x8] sm:$0xff]  ;;  %s172_s29 = smov [#allocation5]  }
  0x14   :  { %31 = vadd.xlane.f32.xlu0 %v29_v0  ;;  %v107_v27 = vld [vmem:[%s230_s1] ss:$0 sm:$0xff]  ;;  %s95_s30 = sshll.u32 %s172_s29, 4  ;;  %s96_s30 = int_to_ptr.vmem [resolvable:$true] %s95_s30 }
  0x15   :  { %v108_v29 = vld [vmem:[%s231_s2] ss:$0 sm:$0xff]  ;;  %s143_s4 = scalar_lea.vmem %s96_s30, 256  ;;  %p148_p9 = scmp.lt.s32.totalorder %s96_s30, %s96_s30 }
  0x16   :  { %p144_p8 = scmp.ne.s32.totalorder %s96_s30, %s143_s4  ;;  %p149_p10 = scmp.lt.s32.totalorder %s143_s4, %s143_s4 }
  0x18   :  { %33 = vadd.xlane.f32.xlu0 %v30_v1  ;;  %p150_p11 = por %p149_p10, %p148_p9 }
  0x1a   :  { %p151_p12 = pnand %p150_p11, %p144_p8 }
  0xa1   :  { %v32_v2 = vpop.xlane.xlu0 %31 }
  0xa2   :  { %v36_v3 = vmul.f32 0.0078125, %v32_v2 }
  0xa4   :  { %v38_v4 = vsub.f32 %v29_v0, %v36_v3 }
  0xa5   :  { %v34_v5 = vpop.xlane.xlu0 %33 }
  0xa6   :  { %v37_v6 = vmul.f32 0.0078125, %v34_v5  ;;  %v40_v7 = vmul.f32 %v38_v4, %v38_v4 }
  0xa8   :  { %v39_v8 = vsub.f32 %v30_v1, %v37_v6  ;;  %42 = vadd.xlane.f32.xlu1 %v40_v7 }
  0xaa   :  { %v41_v9 = vmul.f32 %v39_v8, %v39_v8 }
  0xac   :  { %44 = vadd.xlane.f32.xlu1 %v41_v9 }
 0x135   :  { %v43_v10 = vpop.xlane.xlu1 %42 }
 0x136   :  { %v46_v11 = vmul.f32 0.007874016, %v43_v10 }
 0x138   :  { %113 = vrsqrt.f32 %v46_v11  ;;  %vm50_vm0 = vcmp.eq.f32.partialorder %v46_v11, inf  ;;  %v53_v16 = vand.u32 2147483648, %v46_v11  ;;  %vm52_vm1 = vcmp.eq.f32.partialorder %v46_v11, 0.0 }
 0x139   :  { %v45_v12 = vpop.xlane.xlu1 %44 }
 0x13a   :  { %v47_v13 = vmul.f32 0.007874016, %v45_v12 }
 0x13c   :  { %115 = vrsqrt.f32 %v47_v13  ;;  %vm57_vm2 = vcmp.eq.f32.partialorder %v47_v13, inf  ;;  %v60_v22 = vand.u32 2147483648, %v47_v13  ;;  %vm59_vm3 = vcmp.eq.f32.partialorder %v47_v13, 0.0 }
 0x142   :  { %v114_v14 = vpop.eup %113 }
 0x143   :  { %v49_v15 = vmul.f32 %v114_v14, %v46_v11 }
 0x145   :  { %v51_v17 = vsel %vm50_vm0, %v46_v11, %v49_v15 }
 0x146   :  { %v116_v18 = vpop.eup %115  ;;  %v54_v19 = vsel %vm52_vm1, %v53_v16, %v51_v17 }
 0x147   :  { %v56_v20 = vmul.f32 %v116_v18, %v47_v13  ;;  %v62_v21 = vadd.f32 1e-06, %v54_v19 }
 0x149   :  { %v58_v23 = vsel %vm57_vm2, %v47_v13, %v56_v20  ;;  %117 = vrcp.f32 %v62_v21 }
 0x14a   :  { %v61_v24 = vsel %vm59_vm3, %v60_v22, %v58_v23 }
 0x14b   :  { %v63_v25 = vadd.f32 1e-06, %v61_v24 }
 0x14d   :  { %119 = vrcp.f32 %v63_v25 }
 0x153   :  { %v118_v26 = vpop.eup %117 }
 0x154   :  { %v68_v28 = vmul.f32 %v118_v26, %v38_v4 }
 0x156   :  { %v77_v30 = vmul.f32 %v107_v27, %v68_v28 }
 0x157   :  { %v120_v31 = vpop.eup %119 }
 0x158   :  { %v69_v32 = vmul.f32 %v120_v31, %v39_v8  ;;  %v86_v33 = vadd.f32 %v108_v29, %v77_v30 }
 0x15a   :  { %v78_v34 = vmul.f32 %v107_v27, %v69_v32  ;;  %88 = vst [vmem:[#allocation5] sm:$0xff] %v86_v33 }
 0x15c   :  { %v87_v35 = vadd.f32 %v108_v29, %v78_v34 }
 0x15e   :  { %89 = vst [vmem:[#allocation5 + $0x8] sm:$0xff] %v87_v35 }
 0x15f   :  { %154 = shalt.err (!%p151_p12)
}
 0x160   :  { %s155_s5 = scalar_lea.hbm %s232_s3, 256 }
 0x161   :  { %p156_p13 = scmp.ne.s32.totalorder %s232_s3, %s155_s5  ;;  %p159_p0 = scmp.lt.u32.totalorder %s155_s5, %s232_s3 }
 0x163   :  { %p161_p1 = pnand %p159_p0, %p156_p13 }
 0x165   :  { %164 = shalt.err (!%p161_p1)
}
 0x166   :  { %101 = dma.vmem_to_hbm [thread:$0]  %s96_s30, 256, %s232_s3, [#allocation4], %s170_s22, %s170_s22, %s171_s23  }
 0x167   :  { %167 = dma.done.wait [#allocation4], 256  }
 0x168   :  { %168 = vsyncadd [#allocation4], 4294967040 }
 0x169   :  { %105 = vsyncpa [#allocation3], 1 }
 0x16a   :  { %106 = vsyncpa [#allocation4], 1 }

</bundles_post_ra>
